<compile_context>
chip_gen: v6e
topology: v6e:2x2x1
jax: 0.10.0
libtpu: 0.0.40
codegen_flags: <defaults>
</compile_context>

<pallas_src>
import functools

import jax
import jax.numpy as jnp
from jax.experimental import pallas as pl
from jax.experimental.pallas import tpu as pltpu

_LANE = 128
_SUBLANE_BF16 = 16  # bf16 packs 16 rows per vreg


def _round_up(x, m):
    return ((x + m - 1) // m) * m


def _vmem_capacity_bytes():
    """Generation-aware VMEM capacity (v5e/v6e: 128 MiB, v7x: 64 MiB per TC)."""
    try:
        return int(pltpu.get_tpu_info().vmem_capacity_bytes)
    except Exception:
        return 64 << 20  # conservative (v7x-sized) fallback


# ---------------------------------------------------------------------------
# Kernels
# ---------------------------------------------------------------------------
def _mlp_kernel_resident(x_ref, w1_ref, b1_ref, w2_ref, b2_ref, o_ref):
    # x_ref:[TM,IN_P] f32   w1:[IN_P,HID_P] bf16   b1:[1,HID_P] f32
    # w2:[HID_P,OUT_P] bf16 b2:[1,OUT_P] f32       o:[TM,OUT_P] f32
    x = x_ref[...].astype(jnp.bfloat16)              # VPU cast, hides under MXU
    h = jnp.dot(x, w1_ref[...], preferred_element_type=jnp.float32)
    h = jnp.tanh(h + b1_ref[...])                    # bias + tanh in f32 (VPU/EUP)
    out = jnp.dot(h.astype(jnp.bfloat16), w2_ref[...],
                  preferred_element_type=jnp.float32)
    o_ref[...] = (out + b2_ref[...]).astype(o_ref.dtype)


def _mlp_kernel_hidden_tiled(x_ref, w1_ref, b1_ref, w2_ref, b2_ref, o_ref,
                             acc_ref):
    # Grid = (batch tiles, hid chunks). One hid chunk of fc1+tanh per step;
    # the partial fc2 product accumulates into an f32 VMEM scratch.
    k = pl.program_id(1)

    @pl.when(k == 0)
    def _():
        acc_ref[...] = jnp.zeros_like(acc_ref)

    x = x_ref[...].astype(jnp.bfloat16)
    h = jnp.dot(x, w1_ref[...], preferred_element_type=jnp.float32)
    h = jnp.tanh(h + b1_ref[...])
    acc_ref[...] += jnp.dot(h.astype(jnp.bfloat16), w2_ref[...],
                            preferred_element_type=jnp.float32)

    @pl.when(k == pl.num_programs(1) - 1)
    def _():
        o_ref[...] = (acc_ref[...] + b2_ref[...]).astype(o_ref.dtype)


# ---------------------------------------------------------------------------
# Config selection (batch tile, optional hidden chunk, VMEM limit)
# ---------------------------------------------------------------------------
def _choose_config(B, IN_P, HID_P, OUT_P, hid_chunk):
    vmem_cap = _vmem_capacity_bytes()
    budget = int(0.70 * vmem_cap)
    B16 = _round_up(B, _SUBLANE_BF16)

    weight_bytes = (IN_P * HID_P + HID_P * OUT_P) * 2      # bf16, single-buffered
    bias_bytes = (HID_P + OUT_P) * 4

    def resident_need(tm):
        streams = 2 * tm * (IN_P + OUT_P) * 4               # double-buffered x / out (f32)
        inter = tm * (IN_P * 2 + HID_P * 6)                 # bf16 x, f32 h, bf16 h
        return streams + inter + weight_bytes + bias_bytes

    def tiled_need(tm, thid):
        streams = 2 * tm * (IN_P + OUT_P) * 4
        wts = 2 * (IN_P * thid + thid * OUT_P) * 2          # double-buffered weight chunks
        bias = 2 * thid * 4 + OUT_P * 4
        inter = tm * (IN_P * 2 + thid * 6)
        acc = tm * OUT_P * 4
        return streams + wts + bias + inter + acc

    tm_cands = [t for t in (1024, 512, 256, 128, 64, 32, 16) if t <= B16] or [B16]
    hid_divs = [d for d in range(HID_P, 0, -_LANE) if HID_P % d == 0]

    if hid_chunk is not None:
        if hid_chunk % _LANE or HID_P % hid_chunk:
            raise ValueError("hid_chunk must be a multiple of 128 that divides "
                             "the padded hidden dim")
        thid = hid_chunk
        tm = next((t for t in tm_cands if tiled_need(t, thid) <= budget),
                  tm_cands[-1])
        need = tiled_need(tm, thid)
    else:
        tm = next((t for t in tm_cands if resident_need(t) <= budget), None)
        if tm is not None and weight_bytes <= budget // 2:
            thid = None
            need = resident_need(tm)
        else:
            # Weights too big to sit comfortably in VMEM -> hidden-tiled fallback.
            tm, thid = None, None
            for t in tm_cands:
                d = next((d for d in hid_divs if tiled_need(t, d) <= budget), None)
                if d is not None:
                    tm, thid = t, d
                    break
            if tm is None:                       # best effort; still compiles
                tm, thid = tm_cands[-1], hid_divs[-1]
            need = tiled_need(tm, thid)

    vmem_limit = int(min(max(need + (need >> 2) + (2 << 20), 8 << 20),
                         int(0.9 * vmem_cap)))
    return tm, thid, vmem_limit


# ---------------------------------------------------------------------------
# Parameter prep (pad + cast ONCE) and jitted forward
# ---------------------------------------------------------------------------
def prepare_mlp_params(w1, b1, w2, b2):
    """Pad feature dims to multiples of 128 and cast weights to bf16 once.
    w1:[in,hid]  b1:[1,hid]  w2:[hid,out]  b2:[1,out]."""
    in_size, hid_size = w1.shape
    out_size = w2.shape[1]
    IN_P, HID_P, OUT_P = (_round_up(d, _LANE)
                          for d in (in_size, hid_size, out_size))
    return dict(
        w1=jnp.pad(w1, ((0, IN_P - in_size), (0, HID_P - hid_size))).astype(jnp.bfloat16),
        b1=jnp.pad(b1, ((0, 0), (0, HID_P - hid_size))).astype(jnp.float32),
        w2=jnp.pad(w2, ((0, HID_P - hid_size), (0, OUT_P - out_size))).astype(jnp.bfloat16),
        b2=jnp.pad(b2, ((0, 0), (0, OUT_P - out_size))).astype(jnp.float32),
        out_size=out_size,
    )


@functools.partial(jax.jit, static_argnames=("out_size", "hid_chunk"))
def mlp_forward(x, w1_p, b1_p, w2_p, b2_p, *, out_size, hid_chunk=None):
    """Fused fc1 -> tanh -> fc2.  x:[B,in] f32 (unpadded); w*/b* come from
    prepare_mlp_params.  Returns [B,out] f32 = tanh(x@w1+b1)@w2+b2
    (bf16 MXU matmuls, f32 accumulation)."""
    B, in_size = x.shape
    IN_P, HID_P = w1_p.shape
    OUT_P = w2_p.shape[1]

    TM, THID, vmem_limit = _choose_config(B, IN_P, HID_P, OUT_P, hid_chunk)
    B_P = _round_up(B, TM)
    n_tiles = B_P // TM

    # Only x is padded per call (cheap, fuses under jit). Zero padding is exact:
    # padded x cols hit zero weight rows, tanh(0)=0 hidden padding hits zero w2
    # rows, padded output cols are sliced away.
    x_p = jnp.pad(x, ((0, B_P - B), (0, IN_P - in_size)))

    out_shape = jax.ShapeDtypeStruct((B_P, OUT_P), jnp.float32)

    if THID is None:
        # Fully VMEM-resident weights (single-buffered); 1-D grid over batch tiles.
        out_p = pl.pallas_call(
            _mlp_kernel_resident,
            out_shape=out_shape,
            grid=(n_tiles,),
            in_specs=[
                pl.BlockSpec((TM, IN_P), lambda i: (i, 0)),         # x stream
                pl.BlockSpec((IN_P, HID_P), lambda i: (0, 0),
                             pipeline_mode=pl.Buffered(1)),          # resident w1
                pl.BlockSpec((1, HID_P), lambda i: (0, 0),
                             pipeline_mode=pl.Buffered(1)),          # resident b1
                pl.BlockSpec((HID_P, OUT_P), lambda i: (0, 0),
                             pipeline_mode=pl.Buffered(1)),          # resident w2
                pl.BlockSpec((1, OUT_P), lambda i: (0, 0),
                             pipeline_mode=pl.Buffered(1)),          # resident b2
            ],
            out_specs=pl.BlockSpec((TM, OUT_P), lambda i: (i, 0)),
            compiler_params=pltpu.CompilerParams(
                dimension_semantics=("parallel",),
                vmem_limit_bytes=vmem_limit,
            ),
        )(x_p, w1_p, b1_p, w2_p, b2_p)
    else:
        # Hidden-dim-tiled fallback: 2-D grid (batch tiles, hid chunks).
        out_p = pl.pallas_call(
            _mlp_kernel_hidden_tiled,
            out_shape=out_shape,
            grid=(n_tiles, HID_P // THID),
            in_specs=[
                pl.BlockSpec((TM, IN_P), lambda i, k: (i, 0)),
                pl.BlockSpec((IN_P, THID), lambda i, k: (0, k)),
                pl.BlockSpec((1, THID), lambda i, k: (0, k)),
                pl.BlockSpec((THID, OUT_P), lambda i, k: (k, 0)),
                pl.BlockSpec((1, OUT_P), lambda i, k: (0, 0),
                             pipeline_mode=pl.Buffered(1)),
            ],
            out_specs=pl.BlockSpec((TM, OUT_P), lambda i, k: (i, 0)),
            scratch_shapes=[pltpu.VMEM((TM, OUT_P), jnp.float32)],
            compiler_params=pltpu.CompilerParams(
                dimension_semantics=("parallel", "arbitrary"),
                vmem_limit_bytes=vmem_limit,
            ),
        )(x_p, w1_p, b1_p, w2_p, b2_p)

    # TODO(synk): add an OUT_P "parallel" grid split for v7x when n_tiles < 2 so
    # both TensorCores get work on small-batch / large-feature shapes.
    return out_p[:B, :out_size]


def init_linear_params(key, in_features, out_features, dtype=jnp.float32):
    # Deterministic init mimicking torch.nn.Linear default: U(-1/sqrt(in), 1/sqrt(in)).
    kw, kb = jax.random.split(key)
    bound = 1.0 / jnp.sqrt(jnp.array(in_features, dtype))
    # Stored as [in, out] (transpose of PyTorch's [out, in]) so the kernel does x @ W.
    w = jax.random.uniform(kw, (in_features, out_features), dtype,
                           minval=-bound, maxval=bound)
    b = jax.random.uniform(kb, (1, out_features), dtype,
                           minval=-bound, maxval=bound)
    return w, b


def _ref_bf16(x, w1, b1, w2, b2):
    xb, w1b, w2b = (a.astype(jnp.bfloat16) for a in (x, w1, w2))
    h = jnp.tanh(jnp.dot(xb, w1b, preferred_element_type=jnp.float32) + b1)
    return jnp.dot(h.astype(jnp.bfloat16), w2b,
                   preferred_element_type=jnp.float32) + b2


if __name__ == "__main__":
    # --- Test 1: small synthetic sizes, resident-weight path -------------------
    batch, input_size, hidden_size, output_size = 8, 16, 32, 8

    key = jax.random.PRNGKey(0)
    kx, k1, k2 = jax.random.split(key, 3)
    x = jax.random.normal(kx, (batch, input_size), jnp.float32)
    w1, b1 = init_linear_params(k1, input_size, hidden_size)
    w2, b2 = init_linear_params(k2, hidden_size, output_size)

    params = prepare_mlp_params(w1, b1, w2, b2)
    out = mlp_forward(x, params["w1"], params["b1"], params["w2"], params["b2"],
                      out_size=params["out_size"])
    jax.block_until_ready(out)
    assert out.shape == (batch, output_size)

    ref1 = _ref_bf16(x, w1, b1, w2, b2)
    assert jnp.allclose(out, ref1, atol=1e-4, rtol=1e-4)
    ref1_f32 = jnp.tanh(x @ w1 + b1) @ w2 + b2
    assert jnp.allclose(out, ref1_f32, atol=2e-2, rtol=2e-2)

    # --- Test 2: exercise the hidden-dim-tiled accumulator fallback ------------
    batch2, in2, hid2, out2 = 32, 200, 384, 72
    kx2, k3, k4 = jax.random.split(jax.random.PRNGKey(1), 3)
    x2 = jax.random.normal(kx2, (batch2, in2), jnp.float32)
    w1_2, b1_2 = init_linear_params(k3, in2, hid2)
    w2_2, b2_2 = init_linear_params(k4, hid2, out2)

    p2 = prepare_mlp_params(w1_2, b1_2, w2_2, b2_2)
    out_t = mlp_forward(x2, p2["w1"], p2["b1"], p2["w2"], p2["b2"],
                        out_size=p2["out_size"], hid_chunk=128)
    jax.block_until_ready(out_t)
    assert out_t.shape == (batch2, out2)

    ref2 = _ref_bf16(x2, w1_2, b1_2, w2_2, b2_2)
    assert jnp.allclose(out_t, ref2, atol=2e-3, rtol=2e-3)
    ref2_f32 = jnp.tanh(x2 @ w1_2 + b1_2) @ w2_2 + b2_2
    assert jnp.allclose(out_t, ref2_f32, atol=3e-2, rtol=3e-2)

    print("KERNEL_OK")
</pallas_src>

<mosaic_0001>
module attributes {stable_mosaic.version = 11 : i64} {
  func.func @_mlp_kernel_resident(%arg0: i32, %arg1: memref<16x128xf32, #tpu.memory_space<vmem>>, %arg2: memref<128x128xbf16, #tpu.memory_space<vmem>>, %arg3: memref<1x128xf32, #tpu.memory_space<vmem>>, %arg4: memref<128x128xbf16, #tpu.memory_space<vmem>>, %arg5: memref<1x128xf32, #tpu.memory_space<vmem>>, %arg6: memref<16x128xf32, #tpu.memory_space<vmem>>) attributes {dimension_semantics = [#tpu.dimension_semantics<parallel>], iteration_bounds = array<i64: 1>, scalar_prefetch = 0 : i64, scratch_operands = 0 : i64, tpu.core_type = #tpu.core_type<tc>, window_params = [{transform_indices = @transform_0, window_bounds = array<i64: 16, 128>}, {pipeline_mode = #tpu.pipeline_mode<synchronous>, transform_indices = @transform_1, window_bounds = array<i64: 128, 128>}, {pipeline_mode = #tpu.pipeline_mode<synchronous>, transform_indices = @transform_2, window_bounds = array<i64: 1, 128>}, {pipeline_mode = #tpu.pipeline_mode<synchronous>, transform_indices = @transform_3, window_bounds = array<i64: 128, 128>}, {pipeline_mode = #tpu.pipeline_mode<synchronous>, transform_indices = @transform_4, window_bounds = array<i64: 1, 128>}, {transform_indices = @transform_5, window_bounds = array<i64: 16, 128>}]} {
    %c0 = arith.constant 0 : index
    %c0_0 = arith.constant 0 : index
    %0 = vector.load %arg1[%c0, %c0_0] : memref<16x128xf32, #tpu.memory_space<vmem>>, vector<16x128xf32>
    %1 = arith.truncf %0 : vector<16x128xf32> to vector<16x128xbf16>
    %c0_1 = arith.constant 0 : index
    %c0_2 = arith.constant 0 : index
    %2 = vector.load %arg2[%c0_1, %c0_2] : memref<128x128xbf16, #tpu.memory_space<vmem>>, vector<128x128xbf16>
    %cst = arith.constant dense<0.000000e+00> : vector<16x128xf32>
    %3 = tpu.matmul %1, %2, %cst {dimension_numbers = #tpu.dot_dimension_numbers<[1], [0], [0], [1], [0, 0, 1, 1], [], []>} : vector<16x128xbf16>, vector<128x128xbf16>, vector<16x128xf32> -> vector<16x128xf32>
    %c0_3 = arith.constant 0 : index
    %c0_4 = arith.constant 0 : index
    %4 = vector.load %arg3[%c0_3, %c0_4] : memref<1x128xf32, #tpu.memory_space<vmem>>, vector<1x128xf32>
    %5 = vector.broadcast %4 : vector<1x128xf32> to vector<16x128xf32>
    %6 = arith.addf %3, %5 : vector<16x128xf32>
    %7 = math.tanh %6 : vector<16x128xf32>
    %8 = arith.truncf %7 : vector<16x128xf32> to vector<16x128xbf16>
    %c0_5 = arith.constant 0 : index
    %c0_6 = arith.constant 0 : index
    %9 = vector.load %arg4[%c0_5, %c0_6] : memref<128x128xbf16, #tpu.memory_space<vmem>>, vector<128x128xbf16>
    %cst_7 = arith.constant dense<0.000000e+00> : vector<16x128xf32>
    %10 = tpu.matmul %8, %9, %cst_7 {dimension_numbers = #tpu.dot_dimension_numbers<[1], [0], [0], [1], [0, 0, 1, 1], [], []>} : vector<16x128xbf16>, vector<128x128xbf16>, vector<16x128xf32> -> vector<16x128xf32>
    %c0_8 = arith.constant 0 : index
    %c0_9 = arith.constant 0 : index
    %11 = vector.load %arg5[%c0_8, %c0_9] : memref<1x128xf32, #tpu.memory_space<vmem>>, vector<1x128xf32>
    %12 = vector.broadcast %11 : vector<1x128xf32> to vector<16x128xf32>
    %13 = arith.addf %10, %12 : vector<16x128xf32>
    %c0_10 = arith.constant 0 : index
    %c0_11 = arith.constant 0 : index
    %14 = vector.load %arg6[%c0_10, %c0_11] : memref<16x128xf32, #tpu.memory_space<vmem>>, vector<16x128xf32>
    tpu.vector_store %arg6[%c0_10, %c0_11], %13 {strides = array<i32>} : memref<16x128xf32, #tpu.memory_space<vmem>>, vector<16x128xf32>,
    return
  }
  func.func @transform_0(%arg0: i32) -> (i32, i32) {
    %c0_i32 = arith.constant 0 : i32
    %c0_i32_0 = arith.constant 0 : i32
    return %arg0, %c0_i32 : i32, i32
  }
  func.func @transform_1(%arg0: i32) -> (i32, i32) {
    %c0_i32 = arith.constant 0 : i32
    %c0_i32_0 = arith.constant 0 : i32
    %c0_i32_1 = arith.constant 0 : i32
    return %c0_i32, %c0_i32_0 : i32, i32
  }
  func.func @transform_2(%arg0: i32) -> (i32, i32) {
    %c0_i32 = arith.constant 0 : i32
    %c0_i32_0 = arith.constant 0 : i32
    %c0_i32_1 = arith.constant 0 : i32
    return %c0_i32, %c0_i32_0 : i32, i32
  }
  func.func @transform_3(%arg0: i32) -> (i32, i32) {
    %c0_i32 = arith.constant 0 : i32
    %c0_i32_0 = arith.constant 0 : i32
    %c0_i32_1 = arith.constant 0 : i32
    return %c0_i32, %c0_i32_0 : i32, i32
  }
  func.func @transform_4(%arg0: i32) -> (i32, i32) {
    %c0_i32 = arith.constant 0 : i32
    %c0_i32_0 = arith.constant 0 : i32
    %c0_i32_1 = arith.constant 0 : i32
    return %c0_i32, %c0_i32_0 : i32, i32
  }
  func.func @transform_5(%arg0: i32) -> (i32, i32) {
    %c0_i32 = arith.constant 0 : i32
    %c0_i32_0 = arith.constant 0 : i32
    return %arg0, %c0_i32 : i32, i32
  }
}

</mosaic_0001>

<bundles_post_ra>
// kernel: mlp_forward.1
= control target key start
LH: loop header
LB: loop body
LE: loop exit
PB: predicated region body
PF: predicated region fallthrough
CT: control target
= control target key end

     0   :  { %10 = vsyncpa [#allocation3], 0  ;;  %s493_s0 = inlined_call_operand.vmem [shape: f32[16,128], index: 0, kind: input, shape index: {}]   ;;  %s494_s1 = inlined_call_operand.hbm [shape: bf16[128,128], index: 1, kind: input, shape index: {}]   ;;  %s495_s2 = inlined_call_operand.vmem [shape: f32[1,128], index: 2, kind: input, shape index: {}]   ;;  %s496_s3 = inlined_call_operand.hbm [shape: bf16[128,128], index: 3, kind: input, shape index: {}]   ;;  %s497_s4 = inlined_call_operand.vmem [shape: f32[1,128], index: 4, kind: input, shape index: {}]   ;;  %s498_s5 = inlined_call_operand.vmem [shape: f32[16,128], index: 5, kind: output, shape index: {}]  }
   0x1   :  { %11 = vsyncpa [#allocation5], 0  ;;  %s433_s18 = smov [#allocation2]  }
   0x2   :  { %s19_s19 = sshll.u32 %s433_s18, 4  ;;  %s20_s19 = int_to_ptr.vmem [resolvable:$true] %s19_s19 }
   0x3   :  { %s397_s20 = scalar_lea.vmem %s20_s19, 1024  ;;  %p402_p1 = scmp.lt.s32.totalorder %s20_s19, %s20_s19 }
   0x4   :  { %p398_p0 = scmp.ne.s32.totalorder %s20_s19, %s397_s20  ;;  %p403_p2 = scmp.lt.s32.totalorder %s397_s20, %s397_s20 }
   0x6   :  { %p404_p3 = por %p403_p2, %p402_p1 }
   0x8   :  { %p405_p4 = pnand %p404_p3, %p398_p0 }
   0xa   :  { %408 = shalt.err (!%p405_p4)
}
   0xb   :  { %s434_s21 = smov 64   ;;  %s435_s22 = smov 4  }
   0xc   :  { %25 = dma.hbm_to_vmem [thread:$0]  %s494_s1, 1024, %s20_s19, [#allocation3], %s434_s21, %s434_s21, %s435_s22  }
   0xd   :  { %s436_s25 = smov [#allocation4]  }
   0xe   :  { %s33_s26 = sshll.u32 %s436_s25, 4  ;;  %s34_s26 = int_to_ptr.vmem [resolvable:$true] %s33_s26 }
   0xf   :  { %s417_s27 = scalar_lea.vmem %s34_s26, 1024  ;;  %p422_p6 = scmp.lt.s32.totalorder %s34_s26, %s34_s26 }
  0x10   :  { %p418_p5 = scmp.ne.s32.totalorder %s34_s26, %s417_s27  ;;  %p423_p7 = scmp.lt.s32.totalorder %s417_s27, %s417_s27 }
  0x12   :  { %p424_p8 = por %p423_p7, %p422_p6 }
  0x14   :  { %p425_p9 = pnand %p424_p8, %p418_p5 }
  0x16   :  { %428 = shalt.err (!%p425_p9)
}
  0x17   :  { %39 = dma.hbm_to_vmem [thread:$0]  %s496_s3, 1024, %s34_s26, [#allocation5], %s434_s21, %s434_s21, %s435_s22  }
  0x18   :  { %429 = dma.done.wait [#allocation3], 1024  }
  0x19   :  { %430 = vsyncadd [#allocation3], 4294966272 }
  0x1a   :  { %431 = dma.done.wait [#allocation5], 1024  }
  0x1b   :  { %432 = vsyncadd [#allocation5], 4294966272  ;;  %v437_v0 = vmov 0.0   ;;  %vm438_vm0 = vmmov 0   ;;  %v369_v1 = vld [vmem:[#allocation2 + $0x38] sm:$0xff]   ;;  %v370_v2 = vld [vmem:[#allocation2 + $0x30] sm:$0xff]  }
  0x1c   :  { %323 = vmatprep.subr.bf16.mxu0 %v437_v0  ;;  %339 = vmatprep.mubr.msk.bf16.mxu0 %vm438_vm0, %v437_v0  ;;  %v371_v3 = vld [vmem:[#allocation2 + $0x28] sm:$0xff]   ;;  %v377_v4 = vld [vmem:[#allocation4 + $0x38] sm:$0xff]   ;;  %v372_v5 = vld [vmem:[#allocation2 + $0x20] sm:$0xff]  }
  0x1d   :  { %343 = vmatprep.subr.bf16.mxu1 %v437_v0  ;;  %359 = vmatprep.mubr.msk.bf16.mxu1 %vm438_vm0, %v437_v0  ;;  %v378_v6 = vld [vmem:[#allocation4 + $0x30] sm:$0xff]   ;;  %v373_v7 = vld [vmem:[#allocation2 + $0x18] sm:$0xff]   ;;  %v375_v9 = vld [vmem:[#allocation2 + $0x8] sm:$0xff]  }
  0x1e   :  { %324 = vmatpush3.bf16.msra.mxu0 %v369_v1  ;;  %344 = vmatpush3.bf16.msra.mxu1 %v377_v4  ;;  %v374_v8 = vld [vmem:[#allocation2 + $0x10] sm:$0xff]   ;;  %v376_v10 = vld [vmem:[#allocation2] sm:$0xff]   ;;  %v50_v12 = vld [vmem:[%s493_s0 + $0x8] sm:$0xff] }
  0x1f   :  { %325 = vmatprep.subr.bf16.mxu0 %v437_v0  ;;  %345 = vmatprep.subr.bf16.mxu1 %v437_v0  ;;  %v49_v11 = vld [vmem:[%s493_s0] sm:$0xff]  ;;  %v379_v14 = vld [vmem:[#allocation4 + $0x28] sm:$0xff]   ;;  %v381_v16 = vld [vmem:[#allocation4 + $0x18] sm:$0xff]  }
  0x20   :  { %v51_v13 = vpack.c.bf16 %v50_v12, %v49_v11  ;;  %v380_v15 = vld [vmem:[#allocation4 + $0x20] sm:$0xff]   ;;  %v382_v17 = vld [vmem:[#allocation4 + $0x10] sm:$0xff]   ;;  %v383_v18 = vld [vmem:[#allocation4 + $0x8] sm:$0xff]  }
  0x21   :  { %v384_v19 = vld [vmem:[#allocation4] sm:$0xff]  }
  0x22   :  { %326 = vmatpush3.bf16.msra.mxu0 %v370_v2  ;;  %346 = vmatpush3.bf16.msra.mxu1 %v378_v6  ;;  %v287_v20 = vld [vmem:[%s495_s2] ss:$0 sm:$0xff] }
  0x23   :  { %327 = vmatprep.subr.bf16.mxu0 %v437_v0  ;;  %347 = vmatprep.subr.bf16.mxu1 %v437_v0  ;;  %v296_v30 = vld [vmem:[%s497_s4] ss:$0 sm:$0xff] }
  0x26   :  { %328 = vmatpush3.bf16.msra.mxu0 %v371_v3  ;;  %348 = vmatpush3.bf16.msra.mxu1 %v379_v14 }
  0x27   :  { %329 = vmatprep.subr.bf16.mxu0 %v437_v0  ;;  %349 = vmatprep.subr.bf16.mxu1 %v437_v0 }
  0x2a   :  { %330 = vmatpush3.bf16.msra.mxu0 %v372_v5  ;;  %350 = vmatpush3.bf16.msra.mxu1 %v380_v15 }
  0x2b   :  { %331 = vmatprep.subr.bf16.mxu0 %v437_v0  ;;  %351 = vmatprep.subr.bf16.mxu1 %v437_v0 }
  0x2e   :  { %332 = vmatpush3.bf16.msra.mxu0 %v373_v7  ;;  %352 = vmatpush3.bf16.msra.mxu1 %v381_v16 }
  0x2f   :  { %333 = vmatprep.subr.bf16.mxu0 %v437_v0  ;;  %353 = vmatprep.subr.bf16.mxu1 %v437_v0 }
  0x32   :  { %334 = vmatpush3.bf16.msra.mxu0 %v374_v8  ;;  %354 = vmatpush3.bf16.msra.mxu1 %v382_v17 }
  0x33   :  { %335 = vmatprep.subr.bf16.mxu0 %v437_v0  ;;  %355 = vmatprep.subr.bf16.mxu1 %v437_v0 }
  0x36   :  { %336 = vmatpush3.bf16.msra.mxu0 %v375_v9  ;;  %356 = vmatpush3.bf16.msra.mxu1 %v383_v18 }
  0x37   :  { %337 = vmatprep.subr.bf16.mxu0 %v437_v0  ;;  %357 = vmatprep.subr.bf16.mxu1 %v437_v0 }
  0x3a   :  { %338 = vmatpush3.bf16.msra.mxu0 %v376_v10  ;;  %358 = vmatpush3.bf16.msra.mxu1 %v384_v19 }
  0x3d   :  { %340 = vmatmul.mubr.bf16.vlgmr.msra.gmra.mxu0 %v51_v13 }
  0xfd   :  { %v157_v21 = vpop.f32.mrf.mxu0 }
  0xfe   :  { %v158_v22 = vadd.f32 %v287_v20, %v157_v21 }
  0xff   :  { %v341_v23 = vpop.f32.mrf.mxu0 }
 0x100   :  { %385 = vtanh.f32 %v158_v22 }
 0x101   :  { %v160_v24 = vpop.f32.mrf.mxu0 }
 0x102   :  { %v161_v25 = vadd.f32 %v287_v20, %v160_v24 }
 0x103   :  { %v342_v26 = vpop.f32.mrf.mxu0 }
 0x104   :  { %387 = vtanh.f32 %v161_v25 }
 0x10d   :  { %v386_v27 = vpop.eup %385 }
 0x111   :  { %v388_v28 = vpop.eup %387 }
 0x112   :  { %v166_v29 = vpack.c.bf16 %v388_v28, %v386_v27 }
 0x114   :  { %360 = vmatmul.mubr.bf16.vlgmr.msra.gmra.mxu1 %v166_v29 }
 0x1d4   :  { %v272_v31 = vpop.f32.mrf.mxu1 }
 0x1d5   :  { %v273_v32 = vadd.f32 %v296_v30, %v272_v31 }
 0x1d6   :  { %v361_v33 = vpop.f32.mrf.mxu1 }
 0x1d7   :  { %279 = vst [vmem:[%s498_s5] sm:$0xff] %v273_v32 }
 0x1d8   :  { %v275_v34 = vpop.f32.mrf.mxu1 }
 0x1d9   :  { %v276_v35 = vadd.f32 %v296_v30, %v275_v34 }
 0x1da   :  { %v362_v36 = vpop.f32.mrf.mxu1 }
 0x1db   :  { %280 = vst [vmem:[%s498_s5 + $0x8] sm:$0xff] %v276_v35 }
 0x1dc   :  { %285 = vsyncpa [#allocation3], 1 }
 0x1dd   :  { %286 = vsyncpa [#allocation5], 1 }

</bundles_post_ra>
